<compile_context>
chip_gen: v5e
topology: v5e:2x2
jax: 0.10.0
libtpu: 0.0.40
codegen_flags: <defaults>
</compile_context>

<pallas_src>
import jax
import jax.numpy as jnp
from jax.experimental import pallas as pl
from jax.experimental.pallas import tpu as pltpu


def conv1d_k3_kernel(x_ref, w_ref, b_ref, o_ref):
    """Conv1d(C, C, k=3, stride=1, pad=1) on `bt` whole batch rows.

    x_ref: (bt, C, L) f32   input block (native HBM layout, no pre-pass)
    w_ref: (3, C, C)  bf16  w_ref[k, o, i] = torch_weight[o, i, k] (resident)
    b_ref: (C, 1)     f32   bias column                            (resident)
    o_ref: (bt, C, L) f32   output block (native HBM layout)
    """
    bt, C, L = x_ref.shape

    # Loop-invariant loads / constants hoisted out of the batch loop.
    w0 = w_ref[0]
    w1 = w_ref[1]
    w2 = w_ref[2]
    bias = b_ref[...]                         # (C, 1) broadcasts over L lanes
    zcol = jnp.zeros((C, 1), jnp.float32)

    # One small set of MXU matmuls per batch row; the tap shifts are applied
    # to the matmul outputs, so no stacked/shifted rhs scratch is needed.
    @pl.loop(0, bt)
    def _(b):
        xb = x_ref[b].astype(jnp.bfloat16)                              # (C, L)
        y0 = jnp.dot(w0, xb, preferred_element_type=jnp.float32)        # tap k=0
        y1 = jnp.dot(w1, xb, preferred_element_type=jnp.float32)        # tap k=1
        y2 = jnp.dot(w2, xb, preferred_element_type=jnp.float32)        # tap k=2
        # out[:, l] += y0[:, l-1]   (zero at l = 0)     -> padding=1, left edge
        left = jnp.concatenate([zcol, y0[:, : L - 1]], axis=1)
        # out[:, l] += y2[:, l+1]   (zero at l = L-1)   -> padding=1, right edge
        right = jnp.concatenate([y2[:, 1:], zcol], axis=1)
        o_ref[b] = (y1 + left + right + bias).astype(o_ref.dtype)


def _round_up(x, m):
    return ((x + m - 1) // m) * m


def _vmem_budget_bytes():
    """Per-generation VMEM budget for the double-buffered blocks."""
    try:
        cap = getattr(pltpu.get_tpu_info(), "vmem_capacity_bytes", None)
        if cap:
            # ~1/3 of physical VMEM, clamped: v5e/v6e (128 MiB) -> ~42 MiB,
            # v7x (64 MiB) -> ~21 MiB.
            return int(max(8 << 20, min(cap // 3, 48 << 20)))
    except Exception:
        pass
    return 12 << 20   # conservative fallback (fits the v5e 16 MiB scoped default)


def _pick_batch_tile(B, C, L, budget_bytes):
    """Largest batch tile whose VMEM footprint (with (8,128)/(16,128) tile
    padding and double-buffering) fits the budget; >=2 grid steps when B>=2
    so dual-TensorCore parts get both cores."""
    cs = _round_up(C, 8)
    lp = _round_up(L, 128)
    per_b = 2 * 2 * cs * lp * 4                              # x + out blocks, dbl-buffered, f32
    fixed = (2 * 3 * _round_up(C, 16) * _round_up(C, 128) * 2   # weights bf16, dbl-buffered
             + 2 * cs * 128 * 4                                 # bias
             + 8 * cs * lp * 4)                                 # in-loop intermediates slack
    avail = max(budget_bytes - fixed, per_b)
    bt = max(1, min(B, avail // per_b))
    if B >= 2:
        bt = min(bt, pl.cdiv(B, 2))        # guarantee >= 2 "parallel" grid steps
    return int(bt)


def flatten_head2_forward(x, weight, bias):
    """FlattenHead2.forward == Conv1d(nf, nf, k=3, stride=1, padding=1)(x).

    x:      (B, nf, L) float32
    weight: (nf, nf, 3) float32  (PyTorch OIW layout)
    bias:   (nf,)       float32
    returns (B, nf, L) float32
    """
    B, C, L = x.shape
    C_out, C_in, K = weight.shape
    assert C_out == C and C_in == C and K == 3

    # Tiny wrapper-side ops only (no HBM round trip of x / out):
    # weights re-laid out as (K, C_out, C_in) and cast to bf16 (MXU-native).
    w_stack = jnp.transpose(weight, (2, 0, 1)).astype(jnp.bfloat16)   # (3, C, C)
    b_col = bias.astype(jnp.float32).reshape(C, 1)

    budget = _vmem_budget_bytes()
    bt = _pick_batch_tile(B, C, L, budget)
    grid = (pl.cdiv(B, bt),)

    out = pl.pallas_call(
        conv1d_k3_kernel,
        out_shape=jax.ShapeDtypeStruct((B, C, L), x.dtype),
        grid=grid,
        in_specs=[
            pl.BlockSpec((bt, C, L), lambda i: (i, 0, 0)),
            pl.BlockSpec((3, C, C), lambda i: (0, 0, 0)),   # weights stay resident
            pl.BlockSpec((C, 1), lambda i: (0, 0)),         # bias stays resident
        ],
        out_specs=pl.BlockSpec((bt, C, L), lambda i: (i, 0, 0)),
        compiler_params=pltpu.CompilerParams(
            dimension_semantics=("parallel",),
            vmem_limit_bytes=int(max(32 << 20, budget + (8 << 20))),
        ),
    )(x, w_stack, b_col)
    return out


if __name__ == "__main__":
    # Small shapes consistent with the module (nf = Conv1d channels, L = length).
    B, NF, L, K = 2, 32, 16, 3

    key = jax.random.PRNGKey(0)
    kx, kw, kb = jax.random.split(key, 3)

    x = jax.random.normal(kx, (B, NF, L), dtype=jnp.float32)
    # PyTorch Conv1d weight shape: (out_channels, in_channels, K).
    weight = 0.05 * jax.random.normal(kw, (NF, NF, K), dtype=jnp.float32)
    bias = 0.01 * jax.random.normal(kb, (NF,), dtype=jnp.float32)

    out = flatten_head2_forward(x, weight, bias)
    out = jax.block_until_ready(out)

    # Reference: f32 conv on bf16-rounded operands (the kernel feeds bf16 to
    # the MXU and accumulates in f32, so this isolates accumulation error).
    x_r = x.astype(jnp.bfloat16).astype(jnp.float32)
    w_r = weight.astype(jnp.bfloat16).astype(jnp.float32)
    ref = jax.lax.conv_general_dilated(
        x_r, w_r,
        window_strides=(1,), padding=((1, 1),),
        dimension_numbers=("NCH", "OIH", "NCH"),
    ) + bias.reshape(1, NF, 1)

    assert out.shape == (B, NF, L)
    assert jnp.allclose(out, ref, atol=1e-2, rtol=1e-2), "mismatch vs reference"
    print("KERNEL_OK")
</pallas_src>

<mosaic_0001>
module attributes {stable_mosaic.version = 11 : i64} {
  func.func @conv1d_k3_kernel(%arg0: i32, %arg1: memref<1x32x16xf32, #tpu.memory_space<vmem>>, %arg2: memref<3x32x32xbf16, #tpu.memory_space<vmem>>, %arg3: memref<32x1xf32, #tpu.memory_space<vmem>>, %arg4: memref<1x32x16xf32, #tpu.memory_space<vmem>>) attributes {dimension_semantics = [#tpu.dimension_semantics<parallel>], iteration_bounds = array<i64: 2>, scalar_prefetch = 0 : i64, scratch_operands = 0 : i64, tpu.core_type = #tpu.core_type<tc>, window_params = [{transform_indices = @transform_0, window_bounds = array<i64: 1, 32, 16>}, {pipeline_mode = #tpu.pipeline_mode<synchronous>, transform_indices = @transform_1, window_bounds = array<i64: 3, 32, 32>}, {pipeline_mode = #tpu.pipeline_mode<synchronous>, transform_indices = @transform_2, window_bounds = array<i64: 32, 1>}, {transform_indices = @transform_3, window_bounds = array<i64: 1, 32, 16>}]} {
    %c0 = arith.constant 0 : index
    %c0_0 = arith.constant 0 : index
    %c0_1 = arith.constant 0 : index
    %0 = vector.load %arg2[%c0, %c0_0, %c0_1] : memref<3x32x32xbf16, #tpu.memory_space<vmem>>, vector<1x32x32xbf16>
    %1 = vector.shape_cast %0 : vector<1x32x32xbf16> to vector<32x32xbf16>
    %c1 = arith.constant 1 : index
    %c0_2 = arith.constant 0 : index
    %c0_3 = arith.constant 0 : index
    %2 = vector.load %arg2[%c1, %c0_2, %c0_3] : memref<3x32x32xbf16, #tpu.memory_space<vmem>>, vector<1x32x32xbf16>
    %3 = vector.shape_cast %2 : vector<1x32x32xbf16> to vector<32x32xbf16>
    %c2 = arith.constant 2 : index
    %c0_4 = arith.constant 0 : index
    %c0_5 = arith.constant 0 : index
    %4 = vector.load %arg2[%c2, %c0_4, %c0_5] : memref<3x32x32xbf16, #tpu.memory_space<vmem>>, vector<1x32x32xbf16>
    %5 = vector.shape_cast %4 : vector<1x32x32xbf16> to vector<32x32xbf16>
    %c0_6 = arith.constant 0 : index
    %c0_7 = arith.constant 0 : index
    %6 = vector.load %arg3[%c0_6, %c0_7] : memref<32x1xf32, #tpu.memory_space<vmem>>, vector<32x1xf32>
    %cst = arith.constant 0.000000e+00 : f32
    %7 = vector.broadcast %cst : f32 to vector<32x1xf32>
    %c0_i32 = arith.constant 0 : i32
    %c1_i32 = arith.constant 1 : i32
    %8 = arith.muli %c0_i32, %c1_i32 : i32
    %c0_i32_8 = arith.constant 0 : i32
    %9 = arith.addi %c0_i32_8, %8 : i32
    %10 = arith.index_cast %9 : i32 to index
    %c0_9 = arith.constant 0 : index
    %c0_10 = arith.constant 0 : index
    %11 = vector.load %arg1[%10, %c0_9, %c0_10] : memref<1x32x16xf32, #tpu.memory_space<vmem>>, vector<1x32x16xf32>
    %12 = vector.shape_cast %11 : vector<1x32x16xf32> to vector<32x16xf32>
    %13 = arith.truncf %12 : vector<32x16xf32> to vector<32x16xbf16>
    %cst_11 = arith.constant dense<0.000000e+00> : vector<32x16xf32>
    %14 = tpu.matmul %1, %13, %cst_11 {dimension_numbers = #tpu.dot_dimension_numbers<[1], [0], [0], [1], [0, 0, 1, 1], [], []>} : vector<32x32xbf16>, vector<32x16xbf16>, vector<32x16xf32> -> vector<32x16xf32>
    %cst_12 = arith.constant dense<0.000000e+00> : vector<32x16xf32>
    %15 = tpu.matmul %3, %13, %cst_12 {dimension_numbers = #tpu.dot_dimension_numbers<[1], [0], [0], [1], [0, 0, 1, 1], [], []>} : vector<32x32xbf16>, vector<32x16xbf16>, vector<32x16xf32> -> vector<32x16xf32>
    %cst_13 = arith.constant dense<0.000000e+00> : vector<32x16xf32>
    %16 = tpu.matmul %5, %13, %cst_13 {dimension_numbers = #tpu.dot_dimension_numbers<[1], [0], [0], [1], [0, 0, 1, 1], [], []>} : vector<32x32xbf16>, vector<32x16xbf16>, vector<32x16xf32> -> vector<32x16xf32>
    %17 = vector.extract_strided_slice %14 {offsets = [0, 0], sizes = [32, 15], strides = [1, 1]} : vector<32x16xf32> to vector<32x15xf32>
    %18 = tpu.concatenate %7, %17 in 1 : vector<32x1xf32>, vector<32x15xf32> -> vector<32x16xf32>
    %19 = vector.extract_strided_slice %16 {offsets = [0, 1], sizes = [32, 15], strides = [1, 1]} : vector<32x16xf32> to vector<32x15xf32>
    %20 = tpu.concatenate %19, %7 in 1 : vector<32x15xf32>, vector<32x1xf32> -> vector<32x16xf32>
    %21 = arith.addf %15, %18 : vector<32x16xf32>
    %22 = arith.addf %21, %20 : vector<32x16xf32>
    %23 = vector.broadcast %6 : vector<32x1xf32> to vector<32x16xf32>
    %24 = arith.addf %22, %23 : vector<32x16xf32>
    %25 = arith.index_cast %9 : i32 to index
    %c0_14 = arith.constant 0 : index
    %c0_15 = arith.constant 0 : index
    %26 = vector.load %arg4[%25, %c0_14, %c0_15] : memref<1x32x16xf32, #tpu.memory_space<vmem>>, vector<1x32x16xf32>
    %27 = vector.shape_cast %26 : vector<1x32x16xf32> to vector<32x16xf32>
    %28 = vector.shape_cast %24 : vector<32x16xf32> to vector<1x32x16xf32>
    tpu.vector_store %arg4[%25, %c0_14, %c0_15], %28 {strides = array<i32>} : memref<1x32x16xf32, #tpu.memory_space<vmem>>, vector<1x32x16xf32>,
    %c1_i32_16 = arith.constant 1 : i32
    return
  }
  func.func @transform_0(%arg0: i32) -> (i32, i32, i32) {
    %c0_i32 = arith.constant 0 : i32
    %c0_i32_0 = arith.constant 0 : i32
    %c0_i32_1 = arith.constant 0 : i32
    return %arg0, %c0_i32, %c0_i32_0 : i32, i32, i32
  }
  func.func @transform_1(%arg0: i32) -> (i32, i32, i32) {
    %c0_i32 = arith.constant 0 : i32
    %c0_i32_0 = arith.constant 0 : i32
    %c0_i32_1 = arith.constant 0 : i32
    %c0_i32_2 = arith.constant 0 : i32
    return %c0_i32, %c0_i32_0, %c0_i32_1 : i32, i32, i32
  }
  func.func @transform_2(%arg0: i32) -> (i32, i32) {
    %c0_i32 = arith.constant 0 : i32
    %c0_i32_0 = arith.constant 0 : i32
    %c0_i32_1 = arith.constant 0 : i32
    return %c0_i32, %c0_i32_0 : i32, i32
  }
  func.func @transform_3(%arg0: i32) -> (i32, i32, i32) {
    %c0_i32 = arith.constant 0 : i32
    %c0_i32_0 = arith.constant 0 : i32
    %c0_i32_1 = arith.constant 0 : i32
    return %arg0, %c0_i32, %c0_i32_0 : i32, i32, i32
  }
}

</mosaic_0001>

<bundles_post_ra>
// kernel: tpu_custom_call.1
= control target key start
LH: loop header
LB: loop body
LE: loop exit
PB: predicated region body
PF: predicated region fallthrough
CT: control target
= control target key end

     0   :  { %s536_s12 = smov 0   ;;  %s608_s0 = inlined_call_operand.vmem [shape: f32[2,32,16], index: 0, kind: input, shape index: {}]   ;;  %s609_s1 = inlined_call_operand.vmem [shape: bf16[3,32,32], index: 1, kind: input, shape index: {}]   ;;  %s610_s2 = inlined_call_operand.vmem [shape: f32[32,1], index: 2, kind: input, shape index: {}]   ;;  %s611_s3 = inlined_call_operand.vmem [shape: f32[2,32,16], index: 3, kind: output, shape index: {}]  }
   0x1 LB: > { %s432_s13 = sadd.s32 4294967295, %s511_s12   ;;  %p436_p0 = scmp.ge.s32.totalorder %s511_s12, 1  ;;  %s511_s12 = sphi %s536_s12, %s13_s12  }
   0x2   : > { %p137_p1 = scmp.lt.s32.totalorder %s511_s12, 3 }
   0x4   : > { %p138_p2 = pnand %p436_p0, %p137_p1 }
   0x5   : > { %p161_p3 = scmp.lt.s32.totalorder (!%p138_p2), %s432_s13, 1  ;;  %s514_s5 = smov (!%p138_p2), 1  }
   0x6   : > { %141 = sbr.rel (%p138_p2) target bundleno = 301 (0x12d), region = 32  ;;  %s515_s6 = smov (!%p138_p2), 127  }
   0xb   : > { %s613_s13 = smov (!%p161_p3, %s432_s13), 1  ;;  %v513_v0 = vmov 0   ;;  %v186_v1 = vld [vmem:[%s610_s2] sm:$0xff]  ;;  %v484_v9 = vld [vmem:[%s609_s1 + $0x8] sm:$0xff]  ;;  %vm206_vm0 = vcmask 261120   ;;  %v485_v11 = vld [vmem:[%s609_s1 + $0x10] sm:$0xff] }
   0xc   : > { %502 = vset.pattern.permute.xlu2 %v513_v0  ;;  %503 = vset.pattern.permute.xlu0 %v513_v0  ;;  %s481_s16 = sshll.u32 %s613_s13, 5  ;;  %v483_v8 = vld [vmem:[%s609_s1] sm:$0xff]  ;;  %v488_v12 = vld [vmem:[%s609_s1 + $0x28] sm:$0xff]  ;;  %v486_v13 = vld [vmem:[%s609_s1 + $0x18] sm:$0xff]  ;;  %vm283_vm1 = vcmask 7168   ;;  %vm304_vm2 = vcmask 121856  }
   0xd   : > { %350 = vperm.xlu2 %502, %v186_v1   ;;  %504 = vset.pattern.permute.xlu1 %v513_v0  ;;  %s165_s19 = scalar_lea.vmem %s608_s0, %s481_s16  ;;  %v487_v10 = vld [vmem:[%s609_s1 + $0x20] sm:$0xff]  ;;  %v189_v20 = vld [vmem:[%s610_s2 + $0x18] sm:$0xff]  ;;  %v187_v22 = vld [vmem:[%s610_s2 + $0x8] sm:$0xff]  ;;  %s589_s18 = scalar_lea.vmem %s611_s3, %s481_s16  ;;  %vm372_vm3 = vcmask 130048  }
   0xe   : > { %v192_v2 = vld [vmem:[%s165_s19 + $0x10] sm:$0xff]  ;;  %v193_v3 = vld [vmem:[%s165_s19 + $0x18] sm:$0xff]  ;;  %v190_v4 = vld [vmem:[%s165_s19] sm:$0xff] }
   0xf   : > { %v195_v5 = vpack.c.bf16 %v193_v3, %v192_v2  ;;  %v191_v6 = vld [vmem:[%s165_s19 + $0x8] sm:$0xff]  ;;  %v188_v24 = vld [vmem:[%s610_s2 + $0x10] sm:$0xff] }
  0x10   : > { %v194_v7 = vpack.c.bf16 %v191_v6, %v190_v4 }
  0x11   : > { %219 = vmatpush.bf16.msra.mxu0 %v195_v5  ;;  %489 = vmatpush.bf16.msra.mxu3 %v195_v5 }
  0x12   : > { %254 = vmatpush.bf16.msra.mxu1 %v195_v5  ;;  %331 = vmatpush.bf16.msra.mxu2 %v195_v5 }
  0x15   : > { %220 = vmatpush.bf16.msra.mxu0 %v194_v7  ;;  %490 = vmatpush.bf16.msra.mxu3 %v194_v7 }
  0x16   : > { %255 = vmatpush.bf16.msra.mxu1 %v194_v7  ;;  %332 = vmatpush.bf16.msra.mxu2 %v194_v7 }
  0x18   : > { %457 = vmatmul.msk.bf16.vlgmr.msra.gmra.mxu0 %vm206_vm0, %v483_v8  ;;  %458 = vmatmul.msk.bf16.vlgmr.msra.gmra.mxu3 %vm206_vm0, %v484_v9 }
  0x19   : > { %467 = vmatmul.msk.bf16.vlgmr.msra.gmra.mxu1 %vm206_vm0, %v487_v10  ;;  %477 = vmatmul.msk.bf16.vlgmr.msra.gmra.mxu2 %vm206_vm0, %v485_v11 }
  0x29   : > { %468 = vmatmul.msk.bf16.gmra.mxu1 %vm206_vm0, %v488_v12  ;;  %478 = vmatmul.msk.bf16.gmra.mxu2 %vm206_vm0, %v486_v13 }
  0x67   : > { %v351_v25 = vpop.permute.xlu2 %350 }
  0x95   : > { %v222_v14 = vpop.f32.mrf.mxu0 }
  0x96   : > { %v257_v15 = vpop.f32.mrf.mxu1  ;;  %271 = vrot.lane.b32.xlu0 %v222_v14, %s514_s5 }
  0x97   : > { %292 = vrot.lane.b32.xlu2 %v257_v15, %s515_s6 }
  0x9b   : > { %v227_v16 = vpop.f32.mrf.mxu3 }
  0x9c   : > { %275 = vrot.lane.b32.xlu1 %v227_v16, %s514_s5  ;;  %v334_v26 = vpop.f32.mrf.mxu2 }
  0x9d   : > { %v224_v17 = vpop.f32.mrf.mxu0 }
  0x9e   : > { %v259_v18 = vpop.f32.mrf.mxu1  ;;  %273 = vrot.lane.b32.xlu0 %v224_v17, %s514_s5 }
  0x9f   : > { %294 = vrot.lane.b32.xlu2 %v259_v18, %s515_s6 }
  0xa3   : > { %v229_v19 = vpop.f32.mrf.mxu3 }
  0xa4   : > { %277 = vrot.lane.b32.xlu1 %v229_v19, %s514_s5  ;;  %v336_v30 = vpop.f32.mrf.mxu2 }
  0xa6   : > { %v262_v21 = vpop.f32.mrf.mxu1 }
  0xa7   : > { %296 = vrot.lane.b32.xlu0 %v262_v21, %s515_s6  ;;  %365 = vperm.xlu2 %502, %v189_v20  }
  0xac   : > { %v339_v37 = vpop.f32.mrf.mxu2 }
  0xae   : > { %v264_v23 = vpop.f32.mrf.mxu1 }
  0xaf   : > { %298 = vrot.lane.b32.xlu1 %v264_v23, %s515_s6  ;;  %355 = vperm.xlu0 %503, %v187_v22  }
  0xb4   : > { %v341_v44 = vpop.f32.mrf.mxu2 }
  0xb7   : > { %360 = vperm.xlu1 %504, %v188_v24  }
  0xf1   : > { %v293_v27 = vpop.permute.xlu2 %292 }
  0xf2   : > { %v305_v32 = vsel %vm304_vm2, %v293_v27, 0.0 }
  0xf9   : > { %v295_v41 = vpop.permute.xlu2 %294 }
  0xfa   : > { %v306_v45 = vsel %vm304_vm2, %v295_v41, 0.0 }
 0x101   : > { %v366_v54 = vpop.permute.xlu2 %365 }
 0x108   : > { %v272_v28 = vpop.permute.xlu0 %271 }
 0x109   : > { %v284_v29 = vsel %vm283_vm1, 0.0, %v272_v28 }
 0x10a   : > { %v335_v31 = vadd.f32 %v334_v26, %v284_v29 }
 0x10c   : > { %v344_v33 = vadd.f32 %v335_v31, %v305_v32 }
 0x10e   : > { %v368_v34 = vadd.f32 %v351_v25, %v344_v33  ;;  %v276_v35 = vpop.permute.xlu1 %275 }
 0x10f   : > { %v286_v52 = vsel %vm283_vm1, 0.0, %v276_v35 }
 0x110   : > { %v274_v36 = vpop.permute.xlu0 %273  ;;  %373 = vst.msk [vmem:[%s589_s18] sm:$0xff] %vm372_vm3, %v368_v34  ;;  %v340_v57 = vadd.f32 %v339_v37, %v286_v52 }
 0x111   : > { %v285_v38 = vsel %vm283_vm1, 0.0, %v274_v36 }
 0x112   : > { %v337_v42 = vadd.f32 %v336_v30, %v285_v38 }
 0x114   : > { %v345_v46 = vadd.f32 %v337_v42, %v306_v45 }
 0x116   : > { %v278_v39 = vpop.permute.xlu1 %277 }
 0x117   : > { %v287_v43 = vsel %vm283_vm1, 0.0, %v278_v39 }
 0x118   : > { %v342_v47 = vadd.f32 %v341_v44, %v287_v43 }
 0x119   : > { %v297_v40 = vpop.permute.xlu0 %296 }
 0x11a   : > { %v307_v55 = vsel %vm304_vm2, %v297_v40, 0.0 }
 0x11b   : > { %v346_v58 = vadd.f32 %v340_v57, %v307_v55 }
 0x121   : > { %v299_v48 = vpop.permute.xlu1 %298  ;;  %v356_v49 = vpop.permute.xlu0 %355 }
 0x122   : > { %v308_v50 = vsel %vm304_vm2, %v299_v48, 0.0  ;;  %v369_v51 = vadd.f32 %v356_v49, %v345_v46 }
 0x123   : > { %v347_v53 = vadd.f32 %v342_v47, %v308_v50 }
 0x124   : > { %374 = vst.msk [vmem:[%s589_s18 + $0x8] sm:$0xff] %vm372_vm3, %v369_v51 }
 0x125   : > { %v371_v56 = vadd.f32 %v366_v54, %v347_v53 }
 0x127   : > { %376 = vst.msk [vmem:[%s589_s18 + $0x18] sm:$0xff] %vm372_vm3, %v371_v56 }
 0x129   : > { %v361_v59 = vpop.permute.xlu1 %360 }
 0x12a   : > { %v370_v60 = vadd.f32 %v361_v59, %v346_v58 }
 0x12c   : > { %375 = vst.msk [vmem:[%s589_s18 + $0x10] sm:$0xff] %vm372_vm3, %v370_v60 }
 0x12d PF: > { %s13_s12 = sadd.s32 1, %s511_s12  }
 0x12e   : > { %p10_p4 = scmp.ge.s32.totalorder %s13_s12, 4  }
 0x130   :  { %12 = sbr.rel (!%p10_p4) target bundleno = 1 (0x1), region = 64 }

</bundles_post_ra>
